<compile_context>
chip_gen: v5e
topology: v5e:2x2
jax: 0.10.0
libtpu: 0.0.40
codegen_flags: <defaults>
</compile_context>

<pallas_src>
import jax
import jax.numpy as jnp
from jax.experimental import pallas as pl
from jax.experimental.pallas import tpu as pltpu


def _round_up(x, m):
    return (x + m - 1) // m * m


# ----------------------------------------------------------------------------
# Pallas kernel: word attention + MOE gating + weighted pooling (batched tile)
# ----------------------------------------------------------------------------
def _word_att_kernel(len_ref,    # (bt, 1)      int32: valid length per row
                     h_ref,      # (bt, T, H2)  f32:   GRU output tile
                     w_ref,      # (H2, 2*H2)   mm-dtype: [w1^T | w2^T] fused
                     bc_ref,     # (2, 2*H2)    f32: row0=[b1|b2], row1=[c1|c2]
                     g_ref,      # (2, T+1)     f32: row k = [gate_k.weight, gate_k.bias]
                     out_ref):   # (bt, OUT_W)  f32: [out1 | out2 | weights_2 | pad]
    bt, T, H2 = h_ref.shape
    out_w = out_ref.shape[1]

    h3 = h_ref[...]                                           # (bt, T, H2) f32

    # ---- fused word_weight_1 / word_weight_2 projection (MXU, bf16 in / f32 acc)
    h2d = h3.reshape(bt * T, H2)                              # layout-trivial (T % 8 == 0)
    proj = jnp.dot(h2d.astype(w_ref.dtype), w_ref[...],
                   preferred_element_type=jnp.float32)        # (bt*T, 2*H2)
    proj = jnp.tanh(proj + bc_ref[0:1, :])
    proj3 = proj.reshape(bt, T, 2 * H2)                       # (bt, T, 2*H2)

    # ---- context_weight scores, produced lane-dense (bt, T) directly
    c1 = bc_ref[1:2, :H2]                                     # (1, H2)
    c2 = bc_ref[1:2, H2:]
    s1 = jnp.sum(proj3[:, :, :H2] * c1, axis=-1)              # (bt, T)
    s2 = jnp.sum(proj3[:, :, H2:] * c2, axis=-1)              # (bt, T)

    # ---- length mask built in-kernel from iota + per-row lengths
    pos = jax.lax.broadcasted_iota(jnp.int32, (bt, T), 1)     # (bt, T)
    pad = pos >= len_ref[...]                                 # (bt, 1) broadcast
    neg = jnp.float32(-1.0e9)
    s1 = jnp.where(pad, neg, s1)
    s2 = jnp.where(pad, neg, s2)

    def softmax_rows(x):                                      # softmax over lanes (exact)
        m = jnp.max(x, axis=-1, keepdims=True)
        e = jnp.exp(x - m)
        return e / jnp.sum(e, axis=-1, keepdims=True)

    sm1 = softmax_rows(s1)                                    # (bt, T)
    sm2 = softmax_rows(s2)

    # ---- MOENet gating (two experts)
    g1w = g_ref[0:1, :T]                                      # (1, T)
    g1b = g_ref[0:1, T:]                                      # (1, 1)
    g2w = g_ref[1:2, :T]
    g2b = g_ref[1:2, T:]

    l1a = jnp.sum(sm1 * g1w, axis=-1, keepdims=True) + g1b    # (bt, 1)
    l1b = jnp.sum(sm2 * g1w, axis=-1, keepdims=True) + g1b
    l2a = jnp.sum(sm1 * g2w, axis=-1, keepdims=True) + g2b
    l2b = jnp.sum(sm2 * g2w, axis=-1, keepdims=True) + g2b

    def softmax2(la, lb):                                     # exact 2-way softmax
        m = jnp.maximum(la, lb)
        ea = jnp.exp(la - m)
        eb = jnp.exp(lb - m)
        d = ea + eb
        return ea / d, eb / d

    a1, a2 = softmax2(l1a, l1b)                               # (bt, 1) each
    d1, d2 = softmax2(l2a, l2b)
    mix1 = a1 * sm1 + a2 * sm2                                # (bt, T)  MOE output_1 weights
    mix2 = d1 * sm1 + d2 * sm2                                # (bt, T)  MOE output_2 weights

    # ---- batched weighted pooling on the MXU: (bt,2,T) @ (bt,T,H2) -> (bt,2,H2)
    mix = jnp.stack([mix1, mix2], axis=1)                     # (bt, 2, T)
    pooled = jnp.einsum("bqt,bth->bqh",
                        mix.astype(w_ref.dtype), h3.astype(w_ref.dtype),
                        preferred_element_type=jnp.float32)   # (bt, 2, H2) f32

    # ---- single lane-dense packed output: [out1 | out2 | weights_2 | zero pad]
    parts = [pooled[:, 0, :], pooled[:, 1, :], mix2]
    pad_cols = out_w - (2 * H2 + T)
    if pad_cols:
        parts.append(jnp.zeros((bt, pad_cols), jnp.float32))
    out_ref[...] = jnp.concatenate(parts, axis=-1)


def word_att_pallas(h, lengths, p, *, matmul_dtype=jnp.bfloat16, tile_rows=128):
    """h: (B, T, 2H) f32; lengths: (B,) int32; p: dict of head params."""
    B, T, H2 = h.shape

    # ---- batch tiling: pad B up to the tile size; no quadratic temporaries, so
    # the same tile fits v5e/v6e/v7x VMEM comfortably.
    bt = min(tile_rows, _round_up(B, 8))
    B_pad = _round_up(B, bt)
    nb = B_pad // bt
    # v7x megacore: keep >=2 grid steps when splitting does not shrink the MXU M
    # dimension (bt*T) below ~256.
    if nb == 1 and bt % 16 == 0 and (bt // 2) * T >= 256:
        bt //= 2
        nb = 2

    h_p = jnp.pad(h.astype(jnp.float32), ((0, B_pad - B), (0, 0), (0, 0)))
    len_p = jnp.pad(lengths.astype(jnp.int32), (0, B_pad - B)).reshape(B_pad, 1)

    # ---- wrapper-side parameter packing (tiny, plain JAX)
    w_fused = jnp.concatenate([p["w1"].T, p["w2"].T], axis=1).astype(matmul_dtype)   # (H2, 2H2)
    bc_pack = jnp.stack(
        [jnp.concatenate([p["b1"], p["b2"]]),
         jnp.concatenate([p["c1"].reshape(-1), p["c2"].reshape(-1)])],
        axis=0).astype(jnp.float32)                                                  # (2, 2H2)
    g_pack = jnp.stack(
        [jnp.concatenate([p["g1w"].reshape(-1), p["g1b"].reshape(-1)]),
         jnp.concatenate([p["g2w"].reshape(-1), p["g2b"].reshape(-1)])],
        axis=0).astype(jnp.float32)                                                  # (2, T+1)

    out_w = pl.cdiv(2 * H2 + T, 128) * 128    # lane-dense packed output width

    grid_spec = pltpu.PrefetchScalarGridSpec(
        num_scalar_prefetch=0,
        grid=(nb,),
        in_specs=[
            pl.BlockSpec((bt, 1), lambda b: (b, 0)),              # lengths per row
            pl.BlockSpec((bt, T, H2), lambda b: (b, 0, 0)),       # GRU output tile
            pl.BlockSpec((H2, 2 * H2), lambda b: (0, 0)),         # fused projection weight
            pl.BlockSpec((2, 2 * H2), lambda b: (0, 0)),          # [b1|b2 ; c1|c2]
            pl.BlockSpec((2, T + 1), lambda b: (0, 0)),           # gate weights + biases
        ],
        out_specs=pl.BlockSpec((bt, out_w), lambda b: (b, 0)),    # packed lane-dense output
    )
    packed = pl.pallas_call(
        _word_att_kernel,
        out_shape=jax.ShapeDtypeStruct((B_pad, out_w), jnp.float32),
        grid_spec=grid_spec,
        compiler_params=pltpu.CompilerParams(
            dimension_semantics=("parallel",)),
    )(len_p, h_p, w_fused, bc_pack, g_pack)

    out1 = packed[:B, :H2]
    out2 = packed[:B, H2:2 * H2]
    weights2 = packed[:B, 2 * H2:2 * H2 + T]
    return out1, weights2, out2


# ----------------------------------------------------------------------------
# Plain-JAX glue: bidirectional GRU (PyTorch GRU semantics, batch_first)
# ----------------------------------------------------------------------------
def _gru_direction(x, p, reverse):
    B, T, D = x.shape
    H = p["w_hh"].shape[1]
    xt = jnp.swapaxes(x, 0, 1)                                    # (T, B, D)
    if reverse:
        xt = xt[::-1]
    gi = jnp.einsum("tbd,gd->tbg", xt, p["w_ih"]) + p["b_ih"]     # (T, B, 3H)

    def step(h_prev, gi_t):
        gh = h_prev @ p["w_hh"].T + p["b_hh"]
        i_r, i_z, i_n = jnp.split(gi_t, 3, axis=-1)
        h_r, h_z, h_n = jnp.split(gh, 3, axis=-1)
        r = jax.nn.sigmoid(i_r + h_r)
        z = jax.nn.sigmoid(i_z + h_z)
        n = jnp.tanh(i_n + r * h_n)
        h = (1.0 - z) * n + z * h_prev
        return h, h

    h0 = jnp.zeros((B, H), x.dtype)
    _, hs = jax.lax.scan(step, h0, gi)                            # (T, B, H)
    if reverse:
        hs = hs[::-1]
    return jnp.swapaxes(hs, 0, 1)                                 # (B, T, H)


def bidirectional_gru(x, gru_params):
    fwd = _gru_direction(x, gru_params["fwd"], reverse=False)
    bwd = _gru_direction(x, gru_params["bwd"], reverse=True)
    return jnp.concatenate([fwd, bwd], axis=-1)                   # (B, T, 2H)


# ----------------------------------------------------------------------------
# Pure-JAX reference of the Pallas part (mirrors the PyTorch forward exactly)
# ----------------------------------------------------------------------------
def word_att_reference(h, lengths, p):
    B, T, H2 = h.shape
    o1 = jnp.tanh(h @ p["w1"].T + p["b1"])
    o2 = jnp.tanh(h @ p["w2"].T + p["b2"])
    w1 = o1 @ p["c1"].T                                           # (B, T, 1)
    w2 = o2 @ p["c2"].T
    mask = jnp.arange(T)[None, :, None] >= lengths[:, None, None]
    w1 = jnp.where(mask, -1.0e9, w1)
    w2 = jnp.where(mask, -1.0e9, w2)
    w1 = jax.nn.softmax(w1, axis=1)[..., 0]                       # (B, T)
    w2 = jax.nn.softmax(w2, axis=1)[..., 0]
    inp = jnp.stack([w1, w2], axis=1)                             # (B, 2, T)
    g1 = jax.nn.softmax(inp @ p["g1w"].T + p["g1b"], axis=1)      # (B, 2, 1)
    g2 = jax.nn.softmax(inp @ p["g2w"].T + p["g2b"], axis=1)
    mix1 = jnp.einsum("bij,bjt->bit", g1.transpose(0, 2, 1), inp)[:, 0]   # (B, T)
    mix2 = jnp.einsum("bij,bjt->bit", g2.transpose(0, 2, 1), inp)[:, 0]
    o1f = jnp.einsum("btd,bt->bd", h, mix1)                       # (B, 2H)
    o2f = jnp.einsum("btd,bt->bd", h, mix2)
    return o1f, mix2, o2f


# ----------------------------------------------------------------------------
# Parameter construction (deterministic, synthetic; mirrors __init__ shapes)
# ----------------------------------------------------------------------------
def make_params(key, bert_dim, hidden_size, max_turn):
    H2 = 2 * hidden_size
    ks = jax.random.split(key, 12)
    std = 0.05
    p = {
        "w1": std * jax.random.normal(ks[0], (H2, H2), jnp.float32),
        "b1": jnp.zeros((H2,), jnp.float32),
        "w2": std * jax.random.normal(ks[1], (H2, H2), jnp.float32),
        "b2": jnp.zeros((H2,), jnp.float32),
        "c1": std * jax.random.normal(ks[2], (1, H2), jnp.float32),
        "c2": std * jax.random.normal(ks[3], (1, H2), jnp.float32),
        "g1w": std * jax.random.normal(ks[4], (1, max_turn), jnp.float32),
        "g1b": jnp.zeros((1,), jnp.float32),
        "g2w": std * jax.random.normal(ks[5], (1, max_turn), jnp.float32),
        "g2b": jnp.zeros((1,), jnp.float32),
    }
    gru = {}
    for i, d in enumerate(("fwd", "bwd")):
        gru[d] = {
            "w_ih": std * jax.random.normal(ks[6 + 2 * i], (3 * hidden_size, bert_dim), jnp.float32),
            "w_hh": std * jax.random.normal(ks[7 + 2 * i], (3 * hidden_size, hidden_size), jnp.float32),
            "b_ih": jnp.zeros((3 * hidden_size,), jnp.float32),
            "b_hh": jnp.zeros((3 * hidden_size,), jnp.float32),
        }
    return p, gru


# ----------------------------------------------------------------------------
if __name__ == "__main__":
    B = 2
    max_turn = 8          # == seq length after dropping the leading token
    S = max_turn + 1      # BERT sequence length
    bert_dim = 1024       # hard-coded GRU input_size in the PyTorch module
    hidden_size = 16      # GRU hidden -> 2H = 32

    key = jax.random.PRNGKey(0)
    k_h, k_p = jax.random.split(key)

    # Stand-in for self.bert(...).last_hidden_state  (B, S, 1024)
    bert_last_hidden = jax.random.normal(k_h, (B, S, bert_dim), jnp.float32)
    # attention_mask: row 0 fully valid, row 1 has 6 valid tokens
    attention_mask = jnp.array(
        [[1] * S, [1] * 6 + [0] * (S - 6)], dtype=jnp.int32)

    params, gru_params = make_params(k_p, bert_dim, hidden_size, max_turn)

    # forward (glue): drop CLS token, dropout=identity, bi-GRU, lengths
    hidden = bert_last_hidden[:, 1:, :]                            # (B, T, 1024)
    lengths = jnp.sum(attention_mask, axis=1).astype(jnp.int32) - 1
    gru_out = bidirectional_gru(hidden, gru_params)                # (B, T, 2H)

    # Pallas kernel: attention scoring + masked softmax + MOE + pooling
    out1, weights2, out2 = word_att_pallas(gru_out, lengths, params)
    out1, weights2, out2 = jax.block_until_ready((out1, weights2, out2))

    # correctness check vs. pure-JAX f32 reference of the same math
    # (tolerances account for the bf16 MXU projection + bf16 pooling operands)
    r1, rw2, r2 = word_att_reference(gru_out, lengths, params)
    assert out1.shape == r1.shape and weights2.shape == rw2.shape and out2.shape == r2.shape
    assert jnp.allclose(out1, r1, atol=1e-2, rtol=5e-2), "output_1 mismatch"
    assert jnp.allclose(weights2, rw2, atol=5e-3, rtol=5e-2), "weights_2 mismatch"
    assert jnp.allclose(out2, r2, atol=1e-2, rtol=5e-2), "output_2 mismatch"

    print("KERNEL_OK")
</pallas_src>

<mosaic_0001>
module attributes {stable_mosaic.version = 11 : i64} {
  func.func @_word_att_kernel(%arg0: i32, %arg1: memref<8x1xi32, #tpu.memory_space<vmem>>, %arg2: memref<8x8x32xf32, #tpu.memory_space<vmem>>, %arg3: memref<32x64xbf16, #tpu.memory_space<vmem>>, %arg4: memref<2x64xf32, #tpu.memory_space<vmem>>, %arg5: memref<2x9xf32, #tpu.memory_space<vmem>>, %arg6: memref<8x128xf32, #tpu.memory_space<vmem>>) attributes {dimension_semantics = [#tpu.dimension_semantics<parallel>], iteration_bounds = array<i64: 1>, scalar_prefetch = 0 : i64, scratch_operands = 0 : i64, tpu.core_type = #tpu.core_type<tc>, window_params = [{transform_indices = @transform_0, window_bounds = array<i64: 8, 1>}, {transform_indices = @transform_1, window_bounds = array<i64: 8, 8, 32>}, {pipeline_mode = #tpu.pipeline_mode<synchronous>, transform_indices = @transform_2, window_bounds = array<i64: 32, 64>}, {pipeline_mode = #tpu.pipeline_mode<synchronous>, transform_indices = @transform_3, window_bounds = array<i64: 2, 64>}, {pipeline_mode = #tpu.pipeline_mode<synchronous>, transform_indices = @transform_4, window_bounds = array<i64: 2, 9>}, {transform_indices = @transform_5, window_bounds = array<i64: 8, 128>}]} {
    %c0 = arith.constant 0 : index
    %c0_0 = arith.constant 0 : index
    %c0_1 = arith.constant 0 : index
    %0 = vector.load %arg2[%c0, %c0_0, %c0_1] : memref<8x8x32xf32, #tpu.memory_space<vmem>>, vector<8x8x32xf32>
    %1 = vector.shape_cast %0 : vector<8x8x32xf32> to vector<64x32xf32>
    %2 = arith.truncf %1 : vector<64x32xf32> to vector<64x32xbf16>
    %c0_2 = arith.constant 0 : index
    %c0_3 = arith.constant 0 : index
    %3 = vector.load %arg3[%c0_2, %c0_3] : memref<32x64xbf16, #tpu.memory_space<vmem>>, vector<32x64xbf16>
    %cst = arith.constant dense<0.000000e+00> : vector<64x64xf32>
    %4 = tpu.matmul %2, %3, %cst {dimension_numbers = #tpu.dot_dimension_numbers<[1], [0], [0], [1], [0, 0, 1, 1], [], []>} : vector<64x32xbf16>, vector<32x64xbf16>, vector<64x64xf32> -> vector<64x64xf32>
    %c0_4 = arith.constant 0 : index
    %c0_5 = arith.constant 0 : index
    %5 = vector.load %arg4[%c0_4, %c0_5] : memref<2x64xf32, #tpu.memory_space<vmem>>, vector<1x64xf32>
    %6 = vector.broadcast %5 : vector<1x64xf32> to vector<64x64xf32>
    %7 = arith.addf %4, %6 : vector<64x64xf32>
    %8 = math.tanh %7 : vector<64x64xf32>
    %9 = vector.shape_cast %8 : vector<64x64xf32> to vector<8x8x64xf32>
    %c1 = arith.constant 1 : index
    %c0_6 = arith.constant 0 : index
    %10 = vector.load %arg4[%c1, %c0_6] : memref<2x64xf32, #tpu.memory_space<vmem>>, vector<1x32xf32>
    %c1_7 = arith.constant 1 : index
    %c32 = arith.constant 32 : index
    %11 = vector.load %arg4[%c1_7, %c32] : memref<2x64xf32, #tpu.memory_space<vmem>>, vector<1x32xf32>
    %12 = vector.extract_strided_slice %9 {offsets = [0, 0, 0], sizes = [8, 8, 32], strides = [1, 1, 1]} : vector<8x8x64xf32> to vector<8x8x32xf32>
    %13 = vector.shape_cast %10 : vector<1x32xf32> to vector<1x1x32xf32>
    %14 = vector.broadcast %13 : vector<1x1x32xf32> to vector<8x8x32xf32>
    %15 = arith.mulf %12, %14 : vector<8x8x32xf32>
    %cst_8 = arith.constant dense<0.000000e+00> : vector<8x8xf32>
    %16 = vector.multi_reduction <add>, %15, %cst_8 [2] : vector<8x8x32xf32> to vector<8x8xf32>
    %17 = vector.extract_strided_slice %9 {offsets = [0, 0, 32], sizes = [8, 8, 32], strides = [1, 1, 1]} : vector<8x8x64xf32> to vector<8x8x32xf32>
    %18 = vector.shape_cast %11 : vector<1x32xf32> to vector<1x1x32xf32>
    %19 = vector.broadcast %18 : vector<1x1x32xf32> to vector<8x8x32xf32>
    %20 = arith.mulf %17, %19 : vector<8x8x32xf32>
    %cst_9 = arith.constant dense<0.000000e+00> : vector<8x8xf32>
    %21 = vector.multi_reduction <add>, %20, %cst_9 [2] : vector<8x8x32xf32> to vector<8x8xf32>
    %22 = tpu.iota {dimensions = array<i32: 1>} : vector<8x8xi32>
    %c0_10 = arith.constant 0 : index
    %c0_11 = arith.constant 0 : index
    %23 = vector.load %arg1[%c0_10, %c0_11] : memref<8x1xi32, #tpu.memory_space<vmem>>, vector<8x1xi32>
    %24 = vector.broadcast %23 : vector<8x1xi32> to vector<8x8xi32>
    %25 = arith.cmpi sge, %22, %24 : vector<8x8xi32>
    %cst_12 = arith.constant -1.000000e+09 : f32
    %26 = vector.broadcast %cst_12 : f32 to vector<8x8xf32>
    %27 = arith.select %25, %26, %16 : vector<8x8xi1>, vector<8x8xf32>
    %cst_13 = arith.constant -1.000000e+09 : f32
    %28 = vector.broadcast %cst_13 : f32 to vector<8x8xf32>
    %29 = arith.select %25, %28, %21 : vector<8x8xi1>, vector<8x8xf32>
    %cst_14 = arith.constant dense<0xFF800000> : vector<8xf32>
    %30 = vector.multi_reduction <maximumf>, %27, %cst_14 [1] : vector<8x8xf32> to vector<8xf32>
    %31 = vector.shape_cast %30 : vector<8xf32> to vector<8x1xf32>
    %32 = vector.broadcast %31 : vector<8x1xf32> to vector<8x8xf32>
    %33 = arith.subf %27, %32 : vector<8x8xf32>
    %34 = math.exp %33 : vector<8x8xf32>
    %cst_15 = arith.constant dense<0.000000e+00> : vector<8xf32>
    %35 = vector.multi_reduction <add>, %34, %cst_15 [1] : vector<8x8xf32> to vector<8xf32>
    %36 = vector.shape_cast %35 : vector<8xf32> to vector<8x1xf32>
    %37 = vector.broadcast %36 : vector<8x1xf32> to vector<8x8xf32>
    %38 = arith.divf %34, %37 : vector<8x8xf32>
    %cst_16 = arith.constant dense<0xFF800000> : vector<8xf32>
    %39 = vector.multi_reduction <maximumf>, %29, %cst_16 [1] : vector<8x8xf32> to vector<8xf32>
    %40 = vector.shape_cast %39 : vector<8xf32> to vector<8x1xf32>
    %41 = vector.broadcast %40 : vector<8x1xf32> to vector<8x8xf32>
    %42 = arith.subf %29, %41 : vector<8x8xf32>
    %43 = math.exp %42 : vector<8x8xf32>
    %cst_17 = arith.constant dense<0.000000e+00> : vector<8xf32>
    %44 = vector.multi_reduction <add>, %43, %cst_17 [1] : vector<8x8xf32> to vector<8xf32>
    %45 = vector.shape_cast %44 : vector<8xf32> to vector<8x1xf32>
    %46 = vector.broadcast %45 : vector<8x1xf32> to vector<8x8xf32>
    %47 = arith.divf %43, %46 : vector<8x8xf32>
    %c0_18 = arith.constant 0 : index
    %c0_19 = arith.constant 0 : index
    %48 = vector.load %arg5[%c0_18, %c0_19] : memref<2x9xf32, #tpu.memory_space<vmem>>, vector<1x8xf32>
    %c0_20 = arith.constant 0 : index
    %c8 = arith.constant 8 : index
    %49 = vector.load %arg5[%c0_20, %c8] : memref<2x9xf32, #tpu.memory_space<vmem>>, vector<1x1xf32>
    %c1_21 = arith.constant 1 : index
    %c0_22 = arith.constant 0 : index
    %50 = vector.load %arg5[%c1_21, %c0_22] : memref<2x9xf32, #tpu.memory_space<vmem>>, vector<1x8xf32>
    %c1_23 = arith.constant 1 : index
    %c8_24 = arith.constant 8 : index
    %51 = vector.load %arg5[%c1_23, %c8_24] : memref<2x9xf32, #tpu.memory_space<vmem>>, vector<1x1xf32>
    %52 = vector.broadcast %48 : vector<1x8xf32> to vector<8x8xf32>
    %53 = arith.mulf %38, %52 : vector<8x8xf32>
    %cst_25 = arith.constant dense<0.000000e+00> : vector<8xf32>
    %54 = vector.multi_reduction <add>, %53, %cst_25 [1] : vector<8x8xf32> to vector<8xf32>
    %55 = vector.shape_cast %54 : vector<8xf32> to vector<8x1xf32>
    %56 = vector.broadcast %49 : vector<1x1xf32> to vector<8x1xf32>
    %57 = arith.addf %55, %56 : vector<8x1xf32>
    %58 = vector.broadcast %48 : vector<1x8xf32> to vector<8x8xf32>
    %59 = arith.mulf %47, %58 : vector<8x8xf32>
    %cst_26 = arith.constant dense<0.000000e+00> : vector<8xf32>
    %60 = vector.multi_reduction <add>, %59, %cst_26 [1] : vector<8x8xf32> to vector<8xf32>
    %61 = vector.shape_cast %60 : vector<8xf32> to vector<8x1xf32>
    %62 = vector.broadcast %49 : vector<1x1xf32> to vector<8x1xf32>
    %63 = arith.addf %61, %62 : vector<8x1xf32>
    %64 = vector.broadcast %50 : vector<1x8xf32> to vector<8x8xf32>
    %65 = arith.mulf %38, %64 : vector<8x8xf32>
    %cst_27 = arith.constant dense<0.000000e+00> : vector<8xf32>
    %66 = vector.multi_reduction <add>, %65, %cst_27 [1] : vector<8x8xf32> to vector<8xf32>
    %67 = vector.shape_cast %66 : vector<8xf32> to vector<8x1xf32>
    %68 = vector.broadcast %51 : vector<1x1xf32> to vector<8x1xf32>
    %69 = arith.addf %67, %68 : vector<8x1xf32>
    %70 = vector.broadcast %50 : vector<1x8xf32> to vector<8x8xf32>
    %71 = arith.mulf %47, %70 : vector<8x8xf32>
    %cst_28 = arith.constant dense<0.000000e+00> : vector<8xf32>
    %72 = vector.multi_reduction <add>, %71, %cst_28 [1] : vector<8x8xf32> to vector<8xf32>
    %73 = vector.shape_cast %72 : vector<8xf32> to vector<8x1xf32>
    %74 = vector.broadcast %51 : vector<1x1xf32> to vector<8x1xf32>
    %75 = arith.addf %73, %74 : vector<8x1xf32>
    %76 = arith.maximumf %57, %63 : vector<8x1xf32>
    %77 = arith.subf %57, %76 : vector<8x1xf32>
    %78 = math.exp %77 : vector<8x1xf32>
    %79 = arith.subf %63, %76 : vector<8x1xf32>
    %80 = math.exp %79 : vector<8x1xf32>
    %81 = arith.addf %78, %80 : vector<8x1xf32>
    %82 = arith.divf %78, %81 : vector<8x1xf32>
    %83 = arith.divf %80, %81 : vector<8x1xf32>
    %84 = arith.maximumf %69, %75 : vector<8x1xf32>
    %85 = arith.subf %69, %84 : vector<8x1xf32>
    %86 = math.exp %85 : vector<8x1xf32>
    %87 = arith.subf %75, %84 : vector<8x1xf32>
    %88 = math.exp %87 : vector<8x1xf32>
    %89 = arith.addf %86, %88 : vector<8x1xf32>
    %90 = arith.divf %86, %89 : vector<8x1xf32>
    %91 = arith.divf %88, %89 : vector<8x1xf32>
    %92 = vector.broadcast %82 : vector<8x1xf32> to vector<8x8xf32>
    %93 = arith.mulf %92, %38 : vector<8x8xf32>
    %94 = vector.broadcast %83 : vector<8x1xf32> to vector<8x8xf32>
    %95 = arith.mulf %94, %47 : vector<8x8xf32>
    %96 = arith.addf %93, %95 : vector<8x8xf32>
    %97 = vector.broadcast %90 : vector<8x1xf32> to vector<8x8xf32>
    %98 = arith.mulf %97, %38 : vector<8x8xf32>
    %99 = vector.broadcast %91 : vector<8x1xf32> to vector<8x8xf32>
    %100 = arith.mulf %99, %47 : vector<8x8xf32>
    %101 = arith.addf %98, %100 : vector<8x8xf32>
    %102 = vector.shape_cast %96 : vector<8x8xf32> to vector<8x1x8xf32>
    %103 = vector.shape_cast %101 : vector<8x8xf32> to vector<8x1x8xf32>
    %104 = tpu.concatenate %102, %103 in 1 : vector<8x1x8xf32>, vector<8x1x8xf32> -> vector<8x2x8xf32>
    %105 = arith.truncf %104 : vector<8x2x8xf32> to vector<8x2x8xbf16>
    %106 = arith.truncf %0 : vector<8x8x32xf32> to vector<8x8x32xbf16>
    "tpu.trace_start"() <{level = 10 : i32, message = "bqt,bth->bqh"}> : () -> ()
    %cst_29 = arith.constant dense<0.000000e+00> : vector<8x2x32xf32>
    %107 = tpu.matmul %105, %106, %cst_29 {dimension_numbers = #tpu.dot_dimension_numbers<[2], [1], [1], [2], [0, 0, 0, 1, 1, 2], [0], [0]>} : vector<8x2x8xbf16>, vector<8x8x32xbf16>, vector<8x2x32xf32> -> vector<8x2x32xf32>
    "tpu.trace_stop"() : () -> ()
    %108 = vector.extract_strided_slice %107 {offsets = [0, 0, 0], sizes = [8, 1, 32], strides = [1, 1, 1]} : vector<8x2x32xf32> to vector<8x1x32xf32>
    %109 = vector.shape_cast %108 : vector<8x1x32xf32> to vector<8x32xf32>
    %110 = vector.extract_strided_slice %107 {offsets = [0, 1, 0], sizes = [8, 1, 32], strides = [1, 1, 1]} : vector<8x2x32xf32> to vector<8x1x32xf32>
    %111 = vector.shape_cast %110 : vector<8x1x32xf32> to vector<8x32xf32>
    %cst_30 = arith.constant 0.000000e+00 : f32
    %112 = vector.broadcast %cst_30 : f32 to vector<8x56xf32>
    %113 = tpu.concatenate %109, %111, %101, %112 in 1 : vector<8x32xf32>, vector<8x32xf32>, vector<8x8xf32>, vector<8x56xf32> -> vector<8x128xf32>
    %c0_31 = arith.constant 0 : index
    %c0_32 = arith.constant 0 : index
    %114 = vector.load %arg6[%c0_31, %c0_32] : memref<8x128xf32, #tpu.memory_space<vmem>>, vector<8x128xf32>
    tpu.vector_store %arg6[%c0_31, %c0_32], %113 {strides = array<i32>} : memref<8x128xf32, #tpu.memory_space<vmem>>, vector<8x128xf32>,
    return
  }
  func.func @transform_0(%arg0: i32) -> (i32, i32) {
    %c0_i32 = arith.constant 0 : i32
    %c0_i32_0 = arith.constant 0 : i32
    return %arg0, %c0_i32 : i32, i32
  }
  func.func @transform_1(%arg0: i32) -> (i32, i32, i32) {
    %c0_i32 = arith.constant 0 : i32
    %c0_i32_0 = arith.constant 0 : i32
    %c0_i32_1 = arith.constant 0 : i32
    return %arg0, %c0_i32, %c0_i32_0 : i32, i32, i32
  }
  func.func @transform_2(%arg0: i32) -> (i32, i32) {
    %c0_i32 = arith.constant 0 : i32
    %c0_i32_0 = arith.constant 0 : i32
    %c0_i32_1 = arith.constant 0 : i32
    return %c0_i32, %c0_i32_0 : i32, i32
  }
  func.func @transform_3(%arg0: i32) -> (i32, i32) {
    %c0_i32 = arith.constant 0 : i32
    %c0_i32_0 = arith.constant 0 : i32
    %c0_i32_1 = arith.constant 0 : i32
    return %c0_i32, %c0_i32_0 : i32, i32
  }
  func.func @transform_4(%arg0: i32) -> (i32, i32) {
    %c0_i32 = arith.constant 0 : i32
    %c0_i32_0 = arith.constant 0 : i32
    %c0_i32_1 = arith.constant 0 : i32
    return %c0_i32, %c0_i32_0 : i32, i32
  }
  func.func @transform_5(%arg0: i32) -> (i32, i32) {
    %c0_i32 = arith.constant 0 : i32
    %c0_i32_0 = arith.constant 0 : i32
    return %arg0, %c0_i32 : i32, i32
  }
}

</mosaic_0001>

<bundles_post_ra>
// kernel: tpu_custom_call.1
= control target key start
LH: loop header
LB: loop body
LE: loop exit
PB: predicated region body
PF: predicated region fallthrough
CT: control target
= control target key end

     0   :  { %10 = vsyncpa [#allocation3], 0  ;;  %s1084_s0 = inlined_call_operand.vmem [shape: s32[8,1], index: 0, kind: input, shape index: {}]   ;;  %s1085_s1 = inlined_call_operand.hbm [shape: f32[8,8,32], index: 1, kind: input, shape index: {}]   ;;  %s1086_s2 = inlined_call_operand.hbm [shape: bf16[32,64], index: 2, kind: input, shape index: {}]   ;;  %s1087_s3 = inlined_call_operand.vmem [shape: f32[2,64], index: 3, kind: input, shape index: {}]   ;;  %s1088_s4 = inlined_call_operand.vmem [shape: f32[2,9], index: 4, kind: input, shape index: {}]   ;;  %s1089_s5 = inlined_call_operand.hbm [shape: f32[8,128], index: 5, kind: output, shape index: {}]  }
   0x1   :  { %11 = vsyncpa [#allocation6], 0 }
   0x2   :  { %12 = vsyncpa [#allocation4], 0  ;;  %s19_s20 = sshll.u32 %s1085_s1, 4  ;;  %s875_s21 = smov [#allocation2]   ;;  %s20_s20 = int_to_ptr.hbm [resolvable:$true] %s19_s20 }
   0x3   :  { %s21_s22 = sshll.u32 %s875_s21, 4  ;;  %s32_s25 = sshll.u32 %s1086_s2, 4  ;;  %s22_s22 = int_to_ptr.vmem [resolvable:$true] %s21_s22  ;;  %s33_s25 = int_to_ptr.hbm [resolvable:$true] %s32_s25 }
   0x4   :  { %s876_s26 = smov 128   ;;  %s877_s27 = smov 8  }
   0x5   :  { %27 = dma.hbm_to_vmem [thread:$0]  %s20_s20, 1024, %s22_s22, [#allocation3], %s876_s26, %s876_s26, %s877_s27  }
   0x6   :  { %s878_s28 = smov [#allocation5]   ;;  %s879_s30 = smov 64  }
   0x7   :  { %s34_s29 = sshll.u32 %s878_s28, 4  ;;  %s880_s6 = smov 4   ;;  %s35_s29 = int_to_ptr.vmem [resolvable:$true] %s34_s29 }
   0x8   :  { %40 = dma.hbm_to_vmem [thread:$0]  %s33_s25, 256, %s35_s29, [#allocation6], %s879_s30, %s879_s30, %s880_s6  }
   0x9   :  { %869 = dma.done.wait [#allocation3], 1024  }
   0xa   :  { %870 = vsyncadd [#allocation3], 4294966272 }
   0xb   :  { %871 = dma.done.wait [#allocation6], 256  }
   0xc   :  { %872 = vsyncadd [#allocation6], 4294967040  ;;  %v740_v0 = vld [vmem:[#allocation5 + $0x8] sm:$0xff]  ;;  %v739_v1 = vld [vmem:[#allocation5] sm:$0xff]  ;;  %vm1090_vm0 = vcmask 261120   ;;  %s881_s9 = smov 96  }
   0xd   :  { %v924_v2 = vld [vmem:[#allocation2] sm:$0xff]  ;;  %103 = vmatpush.bf16.msra.mxu0 %v740_v0  ;;  %741 = vmatpush.bf16.msra.mxu3 %v740_v0  ;;  %v926_v3 = vld [vmem:[#allocation2 + $0x8] sm:$0xff]  ;;  %v928_v4 = vld [vmem:[#allocation2 + $0x30] sm:$0xff]  ;;  %vm247_vm1 = vcmask 1041409   ;;  %vm249_vm2 = vcmask 1042434   ;;  %vm251_vm3 = vcmask 1043459  }
   0xe   :  { %v930_v5 = vld [vmem:[#allocation2 + $0x38] sm:$0xff]  ;;  %v62_v6 = vpack.c.bf16 %v926_v3, %v924_v2  ;;  %v938_v8 = vld [vmem:[#allocation2 + $0x10] sm:$0xff]  ;;  %v945_v11 = vld [vmem:[#allocation2 + $0x20] sm:$0xff]  ;;  %vm253_vm4 = vcmask 1044484   ;;  %vm255_vm5 = vcmask 1045509   ;;  %vm257_vm6 = vcmask 1046534  }
   0xf   :  { %v65_v7 = vpack.c.bf16 %v930_v5, %v928_v4  ;;  %v940_v9 = vld [vmem:[#allocation2 + $0x18] sm:$0xff]  ;;  %v947_v12 = vld [vmem:[#allocation2 + $0x28] sm:$0xff]  ;;  %v757_v14 = vld [vmem:[%s1087_s3] ss:$0 sm:$0xff]  ;;  %vm259_vm7 = vcmask 1047559   ;;  %vm288_vm8 = vcmask 64512  }
  0x10   :  { %v63_v10 = vpack.c.bf16 %v940_v9, %v938_v8  ;;  %v64_v13 = vpack.c.bf16 %v947_v12, %v945_v11  ;;  %v758_v18 = vld [vmem:[%s1087_s3 + $0x1] ss:$0 sm:$0xff]  ;;  %s885_s14 = smov [#allocation7]   ;;  %s708_s18 = sshll.u32 %s1089_s5, 4  ;;  %s709_s18 = int_to_ptr.hbm [resolvable:$true] %s708_s18 }
  0x11   :  { %104 = vmatpush.bf16.msra.mxu0 %v739_v1  ;;  %742 = vmatpush.bf16.msra.mxu3 %v739_v1  ;;  %s706_s15 = sshll.u32 %s885_s14, 4  ;;  %s707_s15 = int_to_ptr.vmem [resolvable:$true] %s706_s15 }
  0x14   :  { %727 = vmatmul.msk.bf16.vlgmr.msra.gmra.mxu0 %vm1090_vm0, %v62_v6  ;;  %730 = vmatmul.msk.bf16.vlgmr.msra.gmra.mxu3 %vm1090_vm0, %v65_v7 }
  0x24   :  { %728 = vmatmul.msk.bf16.gmra.mxu0 %vm1090_vm0, %v63_v10  ;;  %v882_v10 = vmov 0  }
  0x25   :  { %754 = vset.pattern.permute.xlu2 %v882_v10 }
  0x34   :  { %729 = vmatmul.msk.bf16.gmra.mxu0 %vm1090_vm0, %v64_v13 }
  0x91   :  { %v106_v15 = vpop.f32.mrf.mxu0 }
  0x92   :  { %v107_v16 = vadd.f32 %v757_v14, %v106_v15 }
  0x94   :  { %761 = vtanh.f32 %v107_v16 }
  0x97   :  { %v121_v17 = vpop.f32.mrf.mxu3 }
  0x98   :  { %v122_v19 = vadd.f32 %v757_v14, %v121_v17 }
  0x99   :  { %v108_v20 = vpop.f32.mrf.mxu0 }
  0x9a   :  { %v762_v21 = vpop.eup %761  ;;  %763 = vtanh.f32 %v122_v19  ;;  %v109_v24 = vadd.f32 %v757_v14, %v108_v20  ;;  %v224_v19 = vlaneseq }
  0x9b   :  { %v136_v22 = vmul.f32 %v762_v21, %v758_v18 }
  0x9c   :  { %765 = vtanh.f32 %v109_v24  ;;  %v225_v21 = vand.u32 127, %v224_v19 }
  0x9d   :  { %176 = vrot.lane.b32.xlu0 %v136_v22, %s881_s9  ;;  %v144_v23 = vsel %vm1090_vm0, %v136_v22, 0.0 }
  0x9e   :  { %145 = vadd.xlane.f32.xlu2 %v144_v23 }
  0x9f   :  { %v123_v33 = vpop.f32.mrf.mxu3 }
  0xa0   :  { %v764_v25 = vpop.eup %763  ;;  %v124_v37 = vadd.f32 %v757_v14, %v123_v33 }
  0xa1   :  { %v111_v26 = vpop.f32.mrf.mxu0  ;;  %v142_v27 = vmul.f32 %v764_v25, %v758_v18 }
  0xa2   :  { %v112_v28 = vadd.f32 %v757_v14, %v111_v26  ;;  %v766_v30 = vpop.eup %765 }
  0xa3   :  { %v162_v29 = vsel %vm1090_vm0, %v142_v27, 0.0  ;;  %v137_v34 = vmul.f32 %v766_v30, %v758_v18 }
  0xa4   :  { %767 = vtanh.f32 %v112_v28  ;;  %163 = vadd.xlane.f32.xlu1 %v162_v29  ;;  %v226_v28 = vld [vmem:[%s1084_s0] sm:$0xff] }
  0xa5   :  { %188 = vrot.lane.b32.xlu0 %v142_v27, %s881_s9  ;;  %769 = vtanh.f32 %v124_v37  ;;  %v147_v51 = vsel %vm1090_vm0, %v137_v34, 0.0 }
  0xa9   :  { %v113_v31 = vpop.f32.mrf.mxu0 }
  0xaa   :  { %v768_v32 = vpop.eup %767  ;;  %v114_v44 = vadd.f32 %v757_v14, %v113_v31 }
  0xab   :  { %v138_v35 = vmul.f32 %v768_v32, %v758_v18  ;;  %v770_v40 = vpop.eup %769 }
  0xac   :  { %v143_v42 = vmul.f32 %v770_v40, %v758_v18 }
  0xad   :  { %178 = vrot.lane.b32.xlu0 %v137_v34, %s881_s9  ;;  %v150_v36 = vsel %vm1090_vm0, %v138_v35, 0.0 }
  0xae   :  { %151 = vadd.xlane.f32.xlu2 %v150_v36  ;;  %v165_v20 = vsel %vm1090_vm0, %v143_v42, 0.0 }
  0xb1   :  { %v116_v38 = vpop.f32.mrf.mxu0 }
  0xb2   :  { %v117_v39 = vadd.f32 %v757_v14, %v116_v38 }
  0xb4   :  { %771 = vtanh.f32 %v117_v39 }
  0xb9   :  { %v118_v41 = vpop.f32.mrf.mxu0 }
  0xba   :  { %v119_v43 = vadd.f32 %v757_v14, %v118_v41  ;;  %v772_v45 = vpop.eup %771 }
  0xbb   :  { %v140_v46 = vmul.f32 %v772_v45, %v758_v18 }
  0xbc   :  { %773 = vtanh.f32 %v119_v43 }
  0xbd   :  { %190 = vrot.lane.b32.xlu1 %v143_v42, %s881_s9  ;;  %775 = vtanh.f32 %v114_v44  ;;  %v156_v52 = vsel %vm1090_vm0, %v140_v46, 0.0 }
  0xc2   :  { %v774_v47 = vpop.eup %773 }
  0xc3   :  { %v776_v48 = vpop.eup %775  ;;  %v141_v49 = vmul.f32 %v774_v47, %v758_v18 }
  0xc4   :  { %v139_v50 = vmul.f32 %v776_v48, %v758_v18 }
  0xc5   :  { %180 = vrot.lane.b32.xlu1 %v138_v35, %s881_s9  ;;  %v159_v54 = vsel %vm1090_vm0, %v141_v49, 0.0 }
  0xc6   :  { %184 = vrot.lane.b32.xlu2 %v140_v46, %s881_s9  ;;  %v153_v53 = vsel %vm1090_vm0, %v139_v50, 0.0 }
  0xcd   :  { %182 = vrot.lane.b32.xlu1 %v139_v50, %s881_s9 }
  0xce   :  { %186 = vrot.lane.b32.xlu2 %v141_v49, %s881_s9 }
  0xd7   :  { %148 = vadd.xlane.f32.xlu0 %v147_v51 }
  0xdf   :  { %157 = vadd.xlane.f32.xlu0 %v156_v52 }
  0xf7   :  { %154 = vadd.xlane.f32.xlu1 %v153_v53  ;;  %160 = vadd.xlane.f32.xlu2 %v159_v54 }
 0x10f   :  { %v177_v55 = vpop.permute.xlu0 %176 }
 0x110   :  { %v200_v56 = vsel %vm1090_vm0, %v177_v55, 0.0 }
 0x111   :  { %201 = vadd.xlane.f32.xlu1 %v200_v56  ;;  %v146_v58 = vpop.xlane.xlu2 %145 }
 0x112   :  { %v239_v23 = vperm.slane %v146_v58, %v225_v21 }
 0x117   :  { %v189_v57 = vpop.permute.xlu0 %188  ;;  %v164_v63 = vpop.xlane.xlu1 %163 }
 0x118   :  { %v218_v59 = vsel %vm1090_vm0, %v189_v57, 0.0  ;;  %v245_v36 = vperm.slane %v164_v63, %v225_v21 }
 0x119   :  { %219 = vadd.xlane.f32.xlu2 %v218_v59 }
 0x11f   :  { %v179_v60 = vpop.permute.xlu0 %178 }
 0x120   :  { %v203_v61 = vsel %vm1090_vm0, %v179_v60, 0.0 }
 0x121   :  { %204 = vadd.xlane.f32.xlu2 %v203_v61  ;;  %v152_v62 = vpop.xlane.xlu2 %151 }
 0x122   :  { %v241_v25 = vperm.slane %v152_v62, %v225_v21 }
 0x129   :  { %v185_v0 = vpop.permute.xlu2 %184 }
 0x12a   :  { %v212_v1 = vsel %vm1090_vm0, %v185_v0, 0.0 }
 0x12b   :  { %213 = vadd.xlane.f32.xlu1 %v212_v1 }
 0x12f   :  { %v191_v6 = vpop.permute.xlu1 %190 }
 0x130   :  { %v221_v7 = vsel %vm1090_vm0, %v191_v6, 0.0 }
 0x131   :  { %v187_v15 = vpop.permute.xlu2 %186 }
 0x132   :  { %v215_v18 = vsel %vm1090_vm0, %v187_v15, 0.0 }
 0x133   :  { %222 = vadd.xlane.f32.xlu1 %v221_v7 }
 0x137   :  { %v181_v13 = vpop.permute.xlu1 %180 }
 0x138   :  { %v206_v14 = vsel %vm1090_vm0, %v181_v13, 0.0 }
 0x139   :  { %207 = vadd.xlane.f32.xlu0 %v206_v14 }
 0x13f   :  { %v183_v16 = vpop.permute.xlu1 %182 }
 0x140   :  { %v209_v17 = vsel %vm1090_vm0, %v183_v16, 0.0 }
 0x141   :  { %210 = vadd.xlane.f32.xlu2 %v209_v17  ;;  %216 = vadd.xlane.f32.xlu0 %v215_v18 }
 0x149   :  { %166 = vadd.xlane.f32.xlu0 %v165_v20 }
 0x14a   :  { %v149_v22 = vpop.xlane.xlu0 %148 }
 0x14b   :  { %v240_v24 = vperm.slane %v149_v22, %v225_v21 }
 0x14d   :  { %v248_v26 = vsel %vm247_vm1, %v240_v24, %v239_v23 }
 0x14e   :  { %v250_v27 = vsel %vm249_vm2, %v241_v25, %v248_v26 }
 0x152   :  { %v158_v29 = vpop.xlane.xlu0 %157 }
 0x153   :  { %v243_v33 = vperm.slane %v158_v29, %v225_v21 }
 0x159   :  { %228 = vperm.xlu2 %754, %v226_v28  }
 0x16a   :  { %v155_v30 = vpop.xlane.xlu1 %154  ;;  %v161_v31 = vpop.xlane.xlu2 %160 }
 0x16b   :  { %v242_v32 = vperm.slane %v155_v30, %v225_v21  ;;  %v244_v35 = vperm.slane %v161_v31, %v225_v21 }
 0x16d   :  { %v252_v34 = vsel %vm251_vm3, %v242_v32, %v250_v27 }
 0x16e   :  { %v254_v37 = vsel %vm253_vm4, %v243_v33, %v252_v34 }
 0x16f   :  { %v256_v38 = vsel %vm255_vm5, %v244_v35, %v254_v37 }
 0x170   :  { %v258_v39 = vsel %vm257_vm6, %v245_v36, %v256_v38 }
 0x184   :  { %v202_v41 = vpop.xlane.xlu1 %201 }
 0x185   :  { %v271_v47 = vperm.slane %v202_v41, %v225_v21 }
 0x18c   :  { %v220_v40 = vpop.xlane.xlu2 %219 }
 0x18d   :  { %v277_v56 = vperm.slane %v220_v40, %v225_v21 }
 0x194   :  { %v205_v42 = vpop.xlane.xlu2 %204 }
 0x195   :  { %v272_v45 = vperm.slane %v205_v42, %v225_v21 }
 0x197   :  { %v279_v50 = vsel %vm247_vm1, %v272_v45, %v271_v47 }
 0x19e   :  { %v214_v44 = vpop.xlane.xlu1 %213 }
 0x19f   :  { %v275_v52 = vperm.slane %v214_v44, %v225_v21 }
 0x1a6   :  { %v223_v57 = vpop.xlane.xlu1 %222 }
 0x1a7   :  { %v278_v61 = vperm.slane %v223_v57, %v225_v21 }
 0x1ac   :  { %v208_v43 = vpop.xlane.xlu0 %207 }
 0x1ad   :  { %v273_v46 = vperm.slane %v208_v43, %v225_v21  ;;  %v759_v43 = vld [vmem:[%s1088_s4 + $0x1] ss:$0 sm:$0xff] }
 0x1af   :  { %v280_v53 = vsel %vm249_vm2, %v273_v46, %v279_v50 }
 0x1b4   :  { %v217_v48 = vpop.xlane.xlu0 %216  ;;  %v211_v49 = vpop.xlane.xlu2 %210 }
 0x1b5   :  { %v274_v51 = vperm.slane %v211_v49, %v225_v21  ;;  %v276_v54 = vperm.slane %v217_v48, %v225_v21 }
 0x1b7   :  { %v281_v55 = vsel %vm251_vm3, %v274_v51, %v280_v53  ;;  %v760_v51 = vld [vmem:[%s1088_s4] ss:$0 sm:$0xff]  ;;  %s884_s4 = smov 32  }
 0x1b8   :  { %v282_v58 = vsel %vm253_vm4, %v275_v52, %v281_v55 }
 0x1b9   :  { %v283_v59 = vsel %vm255_vm5, %v276_v54, %v282_v58 }
 0x1ba   :  { %v284_v60 = vsel %vm257_vm6, %v277_v56, %v283_v59  ;;  %v883_v59 = vmov 8  }
 0x1bb   :  { %v285_v1 = vsel %vm259_vm7, %v278_v61, %v284_v60  ;;  %756 = vset.pattern.permute.xlu0 %v883_v59  ;;  %755 = vset.pattern.permute.xlu1 %v883_v59 }
 0x1bc   :  { %v167_v62 = vpop.xlane.xlu0 %166  ;;  %v229_v63 = vpop.permute.xlu2 %228 }
 0x1bd   :  { %v246_v0 = vperm.slane %v167_v62, %v225_v21  ;;  %vm230_vm9 = vcmp.ge.s32.totalorder %v225_v21, %v229_v63 }
 0x1be   :  { %v287_v6 = vsel %vm230_vm9, -1e+09, %v285_v1 }
 0x1bf   :  { %v313_v7 = vsel %vm288_vm8, %v287_v6, -inf  ;;  %v260_v10 = vsel %vm259_vm7, %v246_v0, %v258_v39 }
 0x1c0   :  { %314 = vmax.xlane.f32.xlu1 %v313_v7  ;;  %v262_v13 = vsel %vm230_vm9, -1e+09, %v260_v10 }
 0x1c1   :  { %v289_v14 = vsel %vm288_vm8, %v262_v13, -inf }
 0x1c2   :  { %290 = vmax.xlane.f32.xlu0 %v289_v14 }
 0x233   :  { %v315_v15 = vpop.xlane.xlu1 %314 }
 0x234   :  { %v316_v16 = vsub.f32 %v287_v6, %v315_v15 }
 0x235   :  { %v291_v17 = vpop.xlane.xlu0 %290 }
 0x236   :  { %v317_v18 = vmul.f32 1.442695, %v316_v16  ;;  %v292_v19 = vsub.f32 %v262_v13, %v291_v17 }
 0x238   :  { %777 = vpow2.f32 %v317_v18  ;;  %v293_v20 = vmul.f32 1.442695, %v292_v19 }
 0x23a   :  { %779 = vpow2.f32 %v293_v20 }
 0x23e   :  { %v778_v21 = vpop.eup %777 }
 0x23f   :  { %v319_v22 = vsel %vm288_vm8, %v778_v21, 0.0 }
 0x240   :  { %v780_v23 = vpop.eup %779  ;;  %320 = vadd.xlane.f32.xlu1 %v319_v22 }
 0x241   :  { %v295_v24 = vsel %vm288_vm8, %v780_v23, 0.0 }
 0x242   :  { %296 = vadd.xlane.f32.xlu0 %v295_v24 }
 0x2b3   :  { %v321_v25 = vpop.xlane.xlu1 %320 }
 0x2b4   :  { %781 = vrcp.f32 %v321_v25  ;;  %v333_v32 = vand.u32 2147483648, %v321_v25  ;;  %v331_v34 = vand.u32 2147483647, %v321_v25  ;;  %vm327_vm11 = vweird.f32 %v321_v25 }
 0x2b5   :  { %v297_v26 = vpop.xlane.xlu0 %296 }
 0x2b6   :  { %783 = vrcp.f32 %v297_v26  ;;  %v309_v36 = vand.u32 2147483648, %v297_v26  ;;  %v307_v39 = vand.u32 2147483647, %v297_v26  ;;  %v334_v40 = vor.u32 1.1754944e-38, %v333_v32 }
 0x2b7   :  { %vm332_vm14 = vcmp.eq.f32.partialorder %v331_v34, 8.507059e+37  ;;  %vm303_vm15 = vweird.f32 %v297_v26 }
 0x2b8   :  { %v310_v45 = vor.u32 1.1754944e-38, %v309_v36  ;;  %vm308_vm0 = vcmp.eq.f32.partialorder %v307_v39, 8.507059e+37 }
 0x2ba   :  { %v782_v27 = vpop.eup %781 }
 0x2bb   :  { %v323_v28 = vmul.f32 %v782_v27, %v321_v25  ;;  %vm328_vm10 = vweird.f32 %v782_v27 }
 0x2bc   :  { %v784_v29 = vpop.eup %783  ;;  %vm329_vm13 = vmor %vm327_vm11, %vm328_vm10 }
 0x2bd   :  { %v324_v30 = vsub.f32 1.0, %v323_v28  ;;  %v299_v31 = vmul.f32 %v784_v29, %v297_v26  ;;  %vm304_vm12 = vweird.f32 %v784_v29 }
 0x2be   :  { %vm305_vm9 = vmor %vm303_vm15, %vm304_vm12 }
 0x2bf   :  { %v325_v33 = vmul.f32 %v782_v27, %v324_v30  ;;  %v300_v35 = vsub.f32 1.0, %v299_v31 }
 0x2c1   :  { %v326_v37 = vadd.f32 %v782_v27, %v325_v33  ;;  %v301_v38 = vmul.f32 %v784_v29, %v300_v35 }
 0x2c3   :  { %v330_v41 = vsel %vm329_vm13, %v782_v27, %v326_v37  ;;  %v302_v42 = vadd.f32 %v784_v29, %v301_v38 }
 0x2c4   :  { %v335_v44 = vsel %vm332_vm14, %v334_v40, %v330_v41 }
 0x2c5   :  { %v306_v46 = vsel %vm305_vm9, %v784_v29, %v302_v42  ;;  %v1006_v47 = vmul.f32 %v778_v21, %v335_v44 }
 0x2c6   :  { %v311_v48 = vsel %vm308_vm0, %v310_v45, %v306_v46 }
 0x2c7   :  { %v356_v49 = vmul.f32 %v759_v43, %v1006_v47  ;;  %v1009_v50 = vmul.f32 %v780_v23, %v311_v48  ;;  %v345_v57 = vmul.f32 %v760_v51, %v1006_v47 }
 0x2c9   :  { %v357_v52 = vsel %vm288_vm8, %v356_v49, 0.0  ;;  %v351_v53 = vmul.f32 %v759_v43, %v1009_v50  ;;  %v340_v54 = vmul.f32 %v760_v51, %v1009_v50  ;;  %v346_v58 = vsel %vm288_vm8, %v345_v57, 0.0 }
 0x2ca   :  { %358 = vadd.xlane.f32.xlu1 %v357_v52 }
 0x2cb   :  { %v352_v55 = vsel %vm288_vm8, %v351_v53, 0.0  ;;  %v341_v56 = vsel %vm288_vm8, %v340_v54, 0.0  ;;  %v491_v54 = vpack.c.bf16 %v924_v2, %v924_v2  ;;  %v494_v2 = vpack.c.bf16 %v940_v9, %v940_v9 }
 0x2cc   :  { %353 = vadd.xlane.f32.xlu0 %v352_v55  ;;  %342 = vadd.xlane.f32.xlu2 %v341_v56  ;;  %v492_v55 = vpack.c.bf16 %v926_v3, %v926_v3  ;;  %v493_v56 = vpack.c.bf16 %v938_v8, %v938_v8  ;;  %v496_v3 = vpack.c.bf16 %v947_v12, %v947_v12 }
 0x2d4   :  { %347 = vadd.xlane.f32.xlu0 %v346_v58 }
 0x33d   :  { %v359_v60 = vpop.xlane.xlu1 %358 }
 0x33e   :  { %v360_v62 = vadd.f32 %v759_v43, %v359_v60  ;;  %v495_v60 = vpack.c.bf16 %v945_v11, %v945_v11 }
 0x33f   :  { %v354_v61 = vpop.xlane.xlu0 %353  ;;  %v343_v7 = vpop.xlane.xlu2 %342 }
 0x340   :  { %v355_v63 = vadd.f32 %v759_v43, %v354_v61  ;;  %v344_v15 = vadd.f32 %v760_v51, %v343_v7 }
 0x342   :  { %v385_v0 = vmax.f32 %v355_v63, %v360_v62 }
 0x344   :  { %v386_v1 = vsub.f32 %v355_v63, %v385_v0  ;;  %v389_v6 = vsub.f32 %v360_v62, %v385_v0 }
 0x346   :  { %v387_v10 = vmul.f32 1.442695, %v386_v1  ;;  %v390_v13 = vmul.f32 1.442695, %v389_v6 }
 0x347   :  { %v348_v14 = vpop.xlane.xlu0 %347 }
 0x348   :  { %785 = vpow2.f32 %v387_v10  ;;  %v349_v16 = vadd.f32 %v760_v51, %v348_v14 }
 0x349   :  { %787 = vpow2.f32 %v390_v13 }
 0x34a   :  { %v361_v17 = vmax.f32 %v344_v15, %v349_v16 }
 0x34c   :  { %v362_v18 = vsub.f32 %v344_v15, %v361_v17  ;;  %v365_v19 = vsub.f32 %v349_v16, %v361_v17  ;;  %v497_v15 = vpack.c.bf16 %v928_v4, %v928_v4 }
 0x34e   :  { %v786_v20 = vpop.eup %785  ;;  %v363_v21 = vmul.f32 1.442695, %v362_v18  ;;  %v366_v22 = vmul.f32 1.442695, %v365_v19  ;;  %v498_v19 = vpack.c.bf16 %v930_v5, %v930_v5 }
 0x34f   :  { %v788_v23 = vpop.eup %787 }
 0x350   :  { %v392_v24 = vadd.f32 %v788_v23, %v786_v20  ;;  %789 = vpow2.f32 %v363_v21 }
 0x351   :  { %791 = vpow2.f32 %v366_v22 }
 0x352   :  { %793 = vrcp.f32 %v392_v24  ;;  %v404_v31 = vand.u32 2147483648, %v392_v24  ;;  %v402_v33 = vand.u32 2147483647, %v392_v24  ;;  %vm398_vm10 = vweird.f32 %v392_v24 }
 0x354   :  { %v405_v36 = vor.u32 1.1754944e-38, %v404_v31  ;;  %vm403_vm12 = vcmp.eq.f32.partialorder %v402_v33, 8.507059e+37 }
 0x356   :  { %v790_v25 = vpop.eup %789 }
 0x357   :  { %v792_v26 = vpop.eup %791 }
 0x358   :  { %v794_v27 = vpop.eup %793  ;;  %v368_v28 = vadd.f32 %v792_v26, %v790_v25 }
 0x359   :  { %v394_v29 = vmul.f32 %v794_v27, %v392_v24  ;;  %vm399_vm0 = vweird.f32 %v794_v27 }
 0x35a   :  { %795 = vrcp.f32 %v368_v28  ;;  %vm400_vm11 = vmor %vm398_vm10, %vm399_vm0  ;;  %v380_v43 = vand.u32 2147483648, %v368_v28  ;;  %v378_v45 = vand.u32 2147483647, %v368_v28  ;;  %vm374_vm14 = vweird.f32 %v368_v28 }
 0x35b   :  { %v395_v30 = vsub.f32 1.0, %v394_v29  ;;  %vm502_vm0 = vcmask 1043456   ;;  %vm474_vm10 = vcmask 1040384  }
 0x35c   :  { %v381_v48 = vor.u32 1.1754944e-38, %v380_v43  ;;  %vm379_vm9 = vcmp.eq.f32.partialorder %v378_v45, 8.507059e+37  ;;  %v504_v57 = vsel %vm502_vm0, %v491_v54, 0  ;;  %v523_v58 = vsel %vm502_vm0, %v492_v55, 0 }
 0x35d   :  { %v396_v32 = vmul.f32 %v794_v27, %v395_v30  ;;  %513 = vmatpush.bf16.msra.mxu1 %v504_v57  ;;  %v542_v59 = vsel %vm502_vm0, %v493_v56, 0  ;;  %532 = vmatpush.bf16.msra.mxu2 %v523_v58  ;;  %v580_v8 = vsel %vm502_vm0, %v495_v60, 0  ;;  %v561_v61 = vsel %vm502_vm0, %v494_v2, 0 }
 0x35e   :  { %551 = vmatpush.bf16.msrb.mxu3 %v542_v59  ;;  %v599_v62 = vsel %vm502_vm0, %v496_v3, 0 }
 0x35f   :  { %v397_v34 = vadd.f32 %v794_v27, %v396_v32 }
 0x360   :  { %v796_v35 = vpop.eup %795 }
 0x361   :  { %v401_v37 = vsel %vm400_vm11, %v794_v27, %v397_v34  ;;  %v370_v38 = vmul.f32 %v796_v35, %v368_v28  ;;  %vm375_vm13 = vweird.f32 %v796_v35  ;;  %589 = vmatpush.bf16.msrb.mxu2 %v580_v8  ;;  %570 = vmatpush.bf16.msrb.mxu1 %v561_v61  ;;  %v637_v27 = vsel %vm502_vm0, %v498_v19, 0 }
 0x362   :  { %v406_v39 = vsel %vm403_vm12, %v405_v36, %v401_v37  ;;  %vm376_vm15 = vmor %vm374_vm14, %vm375_vm13  ;;  %608 = vmatpush.bf16.msra.mxu3 %v599_v62 }
 0x363   :  { %v408_v40 = vmul.f32 %v788_v23, %v406_v39  ;;  %v407_v41 = vmul.f32 %v786_v20, %v406_v39  ;;  %v371_v42 = vsub.f32 1.0, %v370_v38 }
 0x365   :  { %430 = vperm.xlu0 %756, %v408_v40   ;;  %424 = vperm.xlu1 %755, %v407_v41   ;;  %v372_v44 = vmul.f32 %v796_v35, %v371_v42 }
 0x367   :  { %v373_v46 = vadd.f32 %v796_v35, %v372_v44 }
 0x369   :  { %v377_v49 = vsel %vm376_vm15, %v796_v35, %v373_v46 }
 0x36a   :  { %v382_v51 = vsel %vm379_vm9, %v381_v48, %v377_v49 }
 0x36b   :  { %v383_v52 = vmul.f32 %v790_v25, %v382_v51  ;;  %v384_v53 = vmul.f32 %v792_v26, %v382_v51 }
 0x36d   :  { %411 = vperm.xlu1 %755, %v383_v52  }
 0x375   :  { %417 = vperm.xlu1 %755, %v384_v53  }
 0x3d7   :  { %v425_v63 = vpop.permute.xlu1 %424  ;;  %v431_v0 = vpop.permute.xlu0 %430 }
 0x3d8   :  { %v427_v1 = vmul.f32 %v425_v63, %v1009_v50  ;;  %v433_v11 = vmul.f32 %v431_v0, %v1006_v47 }
 0x3da   :  { %v434_v6 = vadd.f32 %v433_v11, %v427_v1 }
 0x3dc   :  { %692 = vrot.lane.b32.xlu1 %v434_v6, %s879_s30  ;;  %v451_v7 = vrot.slane %v434_v6, 1  ;;  %v452_v14 = vrot.slane %v434_v6, 2  ;;  %v458_v17 = vperm.slane %v434_v6, 0  ;;  %v453_v5 = vrot.slane %v434_v6, 3 }
 0x3dd   :  { %v454_v29 = vrot.slane %v434_v6, 4  ;;  %v455_v30 = vrot.slane %v434_v6, 5  ;;  %v456_v42 = vrot.slane %v434_v6, 6  ;;  %v457_v44 = vrot.slane %v434_v6, 7 }
 0x3de   :  { %v459_v18 = vperm.slane %v451_v7, 0  ;;  %v460_v23 = vperm.slane %v452_v14, 0  ;;  %v461_v31 = vperm.slane %v453_v5, 0 }
 0x3df   :  { %v412_v9 = vpop.permute.xlu1 %411  ;;  %v462_v35 = vperm.slane %v454_v29, 0  ;;  %v463_v36 = vperm.slane %v455_v30, 0  ;;  %v464_v45 = vperm.slane %v456_v42, 0  ;;  %v465_v49 = vperm.slane %v457_v44, 0 }
 0x3e0   :  { %v414_v10 = vmul.f32 %v412_v9, %v1009_v50  ;;  %v618_v50 = vsel %vm502_vm0, %v497_v15, 0 }
 0x3e7   :  { %v418_v12 = vpop.permute.xlu1 %417 }
 0x3e8   :  { %v420_v13 = vmul.f32 %v418_v12, %v1006_v47 }
 0x3ea   :  { %v421_v16 = vadd.f32 %v420_v13, %v414_v10 }
 0x3ec   :  { %v475_v20 = vsel %vm474_vm10, %v421_v16, %v458_v17  ;;  %v436_v21 = vrot.slane %v421_v16, 1  ;;  %v437_v22 = vrot.slane %v421_v16, 2  ;;  %v438_v28 = vrot.slane %v421_v16, 3 }
 0x3ed   :  { %v483_v24 = vpack.c.bf16 %v475_v20, %v475_v20  ;;  %v439_v32 = vrot.slane %v421_v16, 4  ;;  %v440_v33 = vrot.slane %v421_v16, 5  ;;  %v441_v43 = vrot.slane %v421_v16, 6 }
 0x3ee   :  { %v476_v47 = vsel %vm474_vm10, %v436_v21, %v459_v18  ;;  %v477_v25 = vsel %vm474_vm10, %v437_v22, %v460_v23  ;;  %v478_v34 = vsel %vm474_vm10, %v438_v28, %v461_v31  ;;  %v442_v46 = vrot.slane %v421_v16, 7 }
 0x3ef   :  { %731 = vmatmul.msk.bf16.vlgmr.msra.gmra.mxu1 %vm288_vm8, %v483_v24  ;;  %v484_v4 = vpack.c.bf16 %v476_v47, %v476_v47  ;;  %v485_v26 = vpack.c.bf16 %v477_v25, %v477_v25  ;;  %v479_v37 = vsel %vm474_vm10, %v439_v32, %v462_v35  ;;  %v480_v38 = vsel %vm474_vm10, %v440_v33, %v463_v36 }
 0x3f0   :  { %627 = vmatpush.bf16.msra.mxu1 %v618_v50  ;;  %v486_v39 = vpack.c.bf16 %v478_v34, %v478_v34  ;;  %v487_v40 = vpack.c.bf16 %v479_v37, %v479_v37  ;;  %v488_v41 = vpack.c.bf16 %v480_v38, %v480_v38  ;;  %v481_v48 = vsel %vm474_vm10, %v441_v43, %v464_v45 }
 0x3f1   :  { %732 = vmatmul.msk.bf16.vlgmr.msra.gmra.mxu2 %vm288_vm8, %v484_v4  ;;  %733 = vmatmul.msk.bf16.vlgmr.msrb.gmra.mxu3 %vm288_vm8, %v485_v26  ;;  %v482_v51 = vsel %vm474_vm10, %v442_v46, %v465_v49  ;;  %v489_v52 = vpack.c.bf16 %v481_v48, %v481_v48 }
 0x3f2   :  { %646 = vmatpush.bf16.msra.mxu2 %v637_v27  ;;  %v490_v53 = vpack.c.bf16 %v482_v51, %v482_v51 }
 0x3ff   :  { %734 = vmatmul.msk.bf16.vlgmr.msrb.gmra.mxu1 %vm288_vm8, %v486_v39 }
 0x401   :  { %735 = vmatmul.msk.bf16.vlgmr.msrb.gmra.mxu2 %vm288_vm8, %v487_v40  ;;  %736 = vmatmul.msk.bf16.vlgmr.msra.gmra.mxu3 %vm288_vm8, %v488_v41 }
 0x40f   :  { %737 = vmatmul.msk.bf16.vlgmr.msra.gmra.mxu1 %vm288_vm8, %v489_v52 }
 0x411   :  { %738 = vmatmul.msk.bf16.vlgmr.msra.gmra.mxu2 %vm288_vm8, %v490_v53 }
 0x44e   :  { %v693_v33 = vpop.permute.xlu1 %692 }
 0x46c   :  { %v515_v54 = vpop.f32.mrf.mxu1 }
 0x46d   :  { %v675_v10 = vrot.slane %v515_v54, 1 }
 0x474   :  { %v517_v55 = vpop.f32.mrf.mxu1  ;;  %v534_v56 = vpop.f32.mrf.mxu2 }
 0x475   :  { %v660_v57 = vrot.slane %v534_v56, 7  ;;  %v553_v58 = vpop.f32.mrf.mxu3  ;;  %v676_v16 = vsel %vm247_vm1, %v534_v56, %v675_v10 }
 0x476   :  { %v662_v59 = vrot.slane %v553_v58, 6  ;;  %v677_v13 = vrot.slane %v553_v58, 7 }
 0x477   :  { %v661_v60 = vsel %vm247_vm1, %v660_v57, %v515_v54  ;;  %vm696_vm1 = vcmask 523264  }
 0x478   :  { %v663_v2 = vsel %vm249_vm2, %v662_v59, %v661_v60  ;;  %v678_v22 = vsel %vm249_vm2, %v677_v13, %v676_v16  ;;  %vm698_vm2 = vcmask 588800  }
 0x47c   :  { %v536_v3 = vpop.f32.mrf.mxu2  ;;  %v572_v8 = vpop.f32.mrf.mxu1 }
 0x47d   :  { %v555_v61 = vpop.f32.mrf.mxu3  ;;  %v664_v62 = vrot.slane %v572_v8, 5  ;;  %v679_v17 = vrot.slane %v572_v8, 6 }
 0x47f   :  { %v665_v63 = vsel %vm251_vm3, %v664_v62, %v663_v2  ;;  %v680_v23 = vsel %vm251_vm3, %v679_v17, %v678_v22  ;;  %vm1091_vm3 = vcmask 261120  }
 0x484   :  { %v574_v0 = vpop.f32.mrf.mxu1  ;;  %v591_v1 = vpop.f32.mrf.mxu2 }
 0x485   :  { %v666_v11 = vrot.slane %v591_v1, 4  ;;  %v610_v6 = vpop.f32.mrf.mxu3  ;;  %v681_v20 = vrot.slane %v591_v1, 5 }
 0x486   :  { %v668_v9 = vrot.slane %v610_v6, 3  ;;  %v683_v24 = vrot.slane %v610_v6, 4 }
 0x487   :  { %v667_v12 = vsel %vm253_vm4, %v666_v11, %v665_v63  ;;  %v682_v50 = vsel %vm253_vm4, %v681_v20, %v680_v23 }
 0x488   :  { %v669_v7 = vsel %vm255_vm5, %v668_v9, %v667_v12  ;;  %v684_v5 = vsel %vm255_vm5, %v683_v24, %v682_v50 }
 0x48c   :  { %v593_v14 = vpop.f32.mrf.mxu2  ;;  %v629_v15 = vpop.f32.mrf.mxu1 }
 0x48d   :  { %v612_v18 = vpop.f32.mrf.mxu3  ;;  %v670_v19 = vrot.slane %v629_v15, 2  ;;  %v685_v47 = vrot.slane %v629_v15, 3 }
 0x48f   :  { %v671_v21 = vsel %vm257_vm6, %v670_v19, %v669_v7  ;;  %v686_v28 = vsel %vm257_vm6, %v685_v47, %v684_v5 }
 0x494   :  { %v631_v25 = vpop.f32.mrf.mxu1  ;;  %v648_v4 = vpop.f32.mrf.mxu2 }
 0x495   :  { %v672_v26 = vrot.slane %v648_v4, 1  ;;  %v687_v27 = vrot.slane %v648_v4, 2 }
 0x497   :  { %v688_v29 = vsel %vm259_vm7, %v687_v27, %v686_v28  ;;  %v673_v30 = vsel %vm259_vm7, %v672_v26, %v671_v21 }
 0x498   :  { %689 = vrot.lane.b32.xlu2 %v688_v29, %s884_s4 }
 0x49c   :  { %v650_v31 = vpop.f32.mrf.mxu2 }
 0x4f2   :  { %v690_v32 = vpop.permute.xlu2 %689 }
 0x4f3   :  { %v695_v34 = vsel %vm1091_vm3, %v673_v30, %v690_v32 }
 0x4f4   :  { %v697_v35 = vsel %vm696_vm1, %v695_v34, %v693_v33 }
 0x4f5   :  { %v699_v36 = vsel %vm698_vm2, %v697_v35, 0.0 }
 0x4f6   :  { %700 = vst [vmem:[#allocation7] sm:$0xff] %v699_v36 }
 0x4f7   :  { %711 = dma.vmem_to_hbm [thread:$0]  %s707_s15, 128, %s709_s18, [#allocation4]  }
 0x4f8   :  { %873 = dma.done.wait [#allocation4], 128  }
 0x4f9   :  { %874 = vsyncadd [#allocation4], 4294967168 }
 0x4fa   :  { %716 = vsyncpa [#allocation3], 1 }
 0x4fb   :  { %717 = vsyncpa [#allocation6], 1 }
 0x4fc   :  { %718 = vsyncpa [#allocation4], 1 }

</bundles_post_ra>
